<compile_context>
chip_gen: v7x
topology: tpu7x:2x2x1
jax: 0.10.0
libtpu: 0.0.40
codegen_flags: <defaults>
</compile_context>

<pallas_src>
import functools

import jax
import jax.numpy as jnp
import numpy as np
from jax.experimental import pallas as pl
from jax.experimental.pallas import tpu as pltpu


def _pair(v):
    return tuple(v) if isinstance(v, (tuple, list)) else (v, v)


def _cdiv(a, b):
    return -(-a // b)


def _round_up(x, m):
    return _cdiv(x, m) * m


def _vmem_capacity_bytes():
    try:
        return int(pltpu.get_tpu_info().vmem_capacity_bytes)
    except Exception:
        return 64 * 1024 * 1024       # conservative (v7x-sized) fallback


def _budgets():
    """Per-generation VMEM limit, single-copy block budget, grid-step policy."""
    cap = _vmem_capacity_bytes()
    vmem_limit = int(cap * 0.8)                      # headroom for Mosaic scratch/sems
    small_part = cap <= 96 * 1024 * 1024             # v7x-class: 64 MiB / TC, 2 TCs
    if small_part:
        block_budget = min(14 * 1024 * 1024, int(vmem_limit * 0.35))
        min_steps, want_even = 8, True               # >= 4 steps per core, even grid
    else:                                            # v5e / v6e: 128 MiB, 1 TC
        block_budget = min(36 * 1024 * 1024, int(vmem_limit * 0.35))
        min_steps, want_even = 4, False
    return vmem_limit, block_budget, min_steps, want_even


def _pick_block_planes(NC, per_plane_bytes, sub, budget, min_steps, want_even):
    """Planes per block: multiple of `sub` (dense sublanes), sized for the VMEM
    budget while keeping enough grid steps for pipelining / both TensorCores."""
    if NC <= sub:
        return NC                                    # tiny problem: single block
    m_budget = max(1, budget // max(1, per_plane_bytes * sub))
    m_grid = max(1, (NC // min_steps) // sub)
    m_cap = max(1, NC // sub)
    m = max(1, min(m_budget, m_grid, m_cap))
    if want_even and _cdiv(NC, m * sub) % 2 == 1:
        for mm in range(m - 1, 0, -1):               # shrink until the grid is even
            if _cdiv(NC, mm * sub) % 2 == 0:
                m = mm
                break
    return m * sub


def _make_fast_kernel(Kh, Kw, OH, OW, dh, OHW, PHASE):
    """stride == 1 path: each (kh, kw) window is one contiguous lane slice of
    the column-phase layout; every load and store is (B, OHW) lane-dense."""
    KK = Kh * Kw

    def kernel(center_ref, cols_ref, out_ref):
        c = center_ref[...]                                        # (B, OHW)
        if KK <= 25:                                               # 3x3 / 5x5: full unroll
            for kh in range(Kh):
                roff = kh * dh * OW
                for kw in range(Kw):
                    base = kw * PHASE + roff
                    win = cols_ref[:, base:base + OHW]
                    k = kh * Kw + kw
                    out_ref[:, k * OHW:(k + 1) * OHW] = c - win
        else:
            # Bound unrolling for large windows (7x7+): loop kh, unroll kw.
            def kh_body(kh, _):
                roff = kh * dh * OW
                for kw in range(Kw):
                    win = cols_ref[:, pl.ds(kw * PHASE + roff, OHW)]
                    out_ref[:, pl.ds((kh * Kw + kw) * OHW, OHW)] = c - win
                return 0
            jax.lax.fori_loop(0, Kh, kh_body, 0)

    return kernel


def _make_general_kernel(KK, OHW):
    """General-stride fallback: windows pre-gathered by the wrapper (and HBM-
    aliased onto the output); kernel is a lane-dense broadcasted subtract."""
    def kernel(center_ref, win_ref, out_ref):
        c = center_ref[...]                                        # (B, OHW)
        if KK <= 25:
            for k in range(KK):
                sl = slice(k * OHW, (k + 1) * OHW)
                out_ref[:, sl] = c - win_ref[:, sl]
        else:
            def body(k, _):
                out_ref[:, pl.ds(k * OHW, OHW)] = c - win_ref[:, pl.ds(k * OHW, OHW)]
                return 0
            jax.lax.fori_loop(0, KK, body, 0)

    return kernel


@functools.partial(jax.jit, static_argnums=(2, 3, 4, 5, 6))
def subtraction2_forward(input1, input2, kernel_size, stride, padding, dilation,
                         pad_mode):
    kernel_size = _pair(kernel_size)
    stride = _pair(stride)
    padding = _pair(padding)
    dilation = _pair(dilation)
    Kh, Kw = kernel_size
    sh, sw = stride
    ph, pw = padding
    dh, dw = dilation

    N, C, H, W = input1.shape
    OH = (H + 2 * ph - (dh * (Kh - 1) + 1)) // sh + 1
    OW = (W + 2 * pw - (dw * (Kw - 1) + 1)) // sw + 1
    NC, OHW, KK = N * C, OH * OW, Kh * Kw
    Hp, Wp = H + 2 * ph, W + 2 * pw
    itemsize = np.dtype(input1.dtype).itemsize
    sub = {4: 8, 2: 16, 1: 32}.get(itemsize, 8)      # dense-sublane multiple per dtype

    # Kernel-center positions of input1 (stride handled here, never in-kernel).
    hc0 = -ph + (Kh - 1) // 2 * dh
    wc0 = -pw + (Kw - 1) // 2 * dw
    assert 0 <= hc0 and hc0 + (OH - 1) * sh < H, "center out of bounds (invalid config)"
    assert 0 <= wc0 and wc0 + (OW - 1) * sw < W, "center out of bounds (invalid config)"
    if pad_mode == 1:
        # jnp.pad 'reflect' matches the CUDA mirror only for padding <= H-1 / W-1.
        assert ph <= H - 1 and pw <= W - 1, "reflect padding must be < spatial extent"

    center = jax.lax.slice(
        input1,
        (0, 0, hc0, wc0),
        (N, C, hc0 + (OH - 1) * sh + 1, wc0 + (OW - 1) * sw + 1),
        (1, 1, sh, sw),
    ).reshape(NC, OHW)

    # Pad input2 according to pad_mode (0 = zero pad, 1 = reflect pad).
    mode = "constant" if pad_mode == 0 else "reflect"
    pad2 = jnp.pad(input2, ((0, 0), (0, 0), (ph, ph), (pw, pw)), mode=mode)
    pad2 = pad2.reshape(NC, Hp, Wp)

    vmem_limit, block_budget, min_steps, want_even = _budgets()
    cparams = pltpu.CompilerParams(
        dimension_semantics=("parallel",),
        vmem_limit_bytes=vmem_limit,
    )

    if sh == 1 and sw == 1:
        # Fast path: Kw column-phase copies of pad2, rows flattened at row
        # stride OW, then flattened to a single lane-dense (NC, Kw*Hp*OW) slab.
        # Window (kh, kw) is the contiguous flat slice
        #   cols[:, kw*Hp*OW + kh*dh*OW : ... + OH*OW].
        PHASE = Hp * OW
        cols = jnp.concatenate(
            [jax.lax.slice(pad2, (0, 0, kw * dw), (NC, Hp, kw * dw + OW))
                 .reshape(NC, PHASE)
             for kw in range(Kw)],
            axis=1,
        )  # (NC, Kw*Hp*OW)

        per_plane = itemsize * (_round_up(OHW, 128)
                                + _round_up(Kw * PHASE, 128)
                                + _round_up(KK * OHW, 128))
        B = _pick_block_planes(NC, per_plane, sub, block_budget, min_steps, want_even)
        grid = (_cdiv(NC, B),)

        out = pl.pallas_call(
            _make_fast_kernel(Kh, Kw, OH, OW, dh, OHW, PHASE),
            out_shape=jax.ShapeDtypeStruct((NC, KK * OHW), input1.dtype),
            grid=grid,
            in_specs=[
                pl.BlockSpec((B, OHW), lambda i: (i, 0)),
                pl.BlockSpec((B, Kw * PHASE), lambda i: (i, 0)),
            ],
            out_specs=pl.BlockSpec((B, KK * OHW), lambda i: (i, 0)),
            compiler_params=cparams,
        )(center, cols)
    else:
        # General-stride fallback: strided window gather done by XLA in the
        # wrapper (keeps strided access off the lane axis); the pre-gathered
        # windows buffer is HBM-aliased onto the output.
        wins = []
        for kh in range(Kh):
            for kw in range(Kw):
                sl = jax.lax.slice(
                    pad2,
                    (0, kh * dh, kw * dw),
                    (NC, kh * dh + (OH - 1) * sh + 1, kw * dw + (OW - 1) * sw + 1),
                    (1, sh, sw),
                )
                wins.append(sl.reshape(NC, OHW))
        windows = jnp.concatenate(wins, axis=1)  # (NC, KK*OHW) == output shape

        per_plane = itemsize * (_round_up(OHW, 128) + 2 * _round_up(KK * OHW, 128))
        B = _pick_block_planes(NC, per_plane, sub, block_budget, min_steps, want_even)
        grid = (_cdiv(NC, B),)

        out = pl.pallas_call(
            _make_general_kernel(KK, OHW),
            out_shape=jax.ShapeDtypeStruct((NC, KK * OHW), input1.dtype),
            grid=grid,
            in_specs=[
                pl.BlockSpec((B, OHW), lambda i: (i, 0)),
                pl.BlockSpec((B, KK * OHW), lambda i: (i, 0)),
            ],
            out_specs=pl.BlockSpec((B, KK * OHW), lambda i: (i, 0)),
            input_output_aliases={1: 0},   # reuse the windows buffer as the output
            compiler_params=cparams,
        )(center, windows)

    return out.reshape(N, C, KK, OHW)


def _reference(x1, x2, kernel_size, stride, padding, dilation, pad_mode):
    """Direct numpy transcription of the CUDA forward kernels."""
    x1 = np.asarray(x1)
    x2 = np.asarray(x2)
    Kh, Kw = _pair(kernel_size)
    sh, sw = _pair(stride)
    ph, pw = _pair(padding)
    dh, dw = _pair(dilation)
    N, C, H, W = x1.shape
    OH = (H + 2 * ph - (dh * (Kh - 1) + 1)) // sh + 1
    OW = (W + 2 * pw - (dw * (Kw - 1) + 1)) // sw + 1
    out = np.zeros((N, C, Kh * Kw, OH * OW), x1.dtype)
    for n in range(N):
        for c in range(C):
            for h in range(OH):
                for w in range(OW):
                    hc = -ph + h * sh + (Kh - 1) // 2 * dh
                    wc = -pw + w * sw + (Kw - 1) // 2 * dw
                    center = x1[n, c, hc, wc]
                    for kh in range(Kh):
                        for kw in range(Kw):
                            hi = -ph + h * sh + kh * dh
                            wi = -pw + w * sw + kw * dw
                            if pad_mode == 0:
                                if 0 <= hi < H and 0 <= wi < W:
                                    v = center - x2[n, c, hi, wi]
                                else:
                                    v = center
                            else:
                                if hi < 0:
                                    hi = -hi
                                if hi >= H:
                                    hi = 2 * (H - 1) - hi
                                if wi < 0:
                                    wi = -wi
                                if wi >= W:
                                    wi = 2 * (W - 1) - wi
                                v = center - x2[n, c, hi, wi]
                            out[n, c, kh * Kw + kw, h * OW + w] = v
    return out


if __name__ == "__main__":
    key = jax.random.PRNGKey(0)
    k1, k2 = jax.random.split(key)
    N, C, H, W = 2, 4, 16, 16
    input1 = jax.random.normal(k1, (N, C, H, W), dtype=jnp.float32)
    input2 = jax.random.normal(k2, (N, C, H, W), dtype=jnp.float32)

    # (kernel_size, stride, padding, dilation):
    #   stride=1 exercises the fast lane-dense windowing path,
    #   stride=2 exercises the aliased general fallback path.
    configs = [(3, 1, 1, 1), (3, 2, 1, 1)]
    for (ks, st, pd, dl) in configs:
        for pad_mode in (0, 1):  # 0: zero pad, 1: reflect pad
            out = subtraction2_forward(input1, input2, ks, st, pd, dl, pad_mode)
            out = jax.block_until_ready(out)
            ref = _reference(input1, input2, ks, st, pd, dl, pad_mode)
            assert out.shape == ref.shape, (out.shape, ref.shape)
            if not np.allclose(np.asarray(out), ref, atol=1e-5, rtol=1e-5):
                raise AssertionError(
                    f"mismatch for config ks={ks} st={st} pd={pd} dl={dl} "
                    f"pad_mode={pad_mode}")

    print("KERNEL_OK")
</pallas_src>

<mosaic_0001>
module attributes {stable_mosaic.version = 11 : i64} {
  func.func @kernel(%arg0: i32, %arg1: memref<8x256xf32, #tpu.memory_space<vmem>>, %arg2: memref<8x864xf32, #tpu.memory_space<vmem>>, %arg3: memref<8x2304xf32, #tpu.memory_space<vmem>>) attributes {dimension_semantics = [#tpu.dimension_semantics<parallel>], iteration_bounds = array<i64: 1>, scalar_prefetch = 0 : i64, scratch_operands = 0 : i64, tpu.core_type = #tpu.core_type<tc>, window_params = [{transform_indices = @transform_0, window_bounds = array<i64: 8, 256>}, {transform_indices = @transform_1, window_bounds = array<i64: 8, 864>}, {transform_indices = @transform_2, window_bounds = array<i64: 8, 2304>}]} {
    %c0 = arith.constant 0 : index
    %c0_0 = arith.constant 0 : index
    %0 = vector.load %arg1[%c0, %c0_0] : memref<8x256xf32, #tpu.memory_space<vmem>>, vector<8x256xf32>
    %c0_1 = arith.constant 0 : index
    %c0_2 = arith.constant 0 : index
    %1 = vector.load %arg2[%c0_1, %c0_2] : memref<8x864xf32, #tpu.memory_space<vmem>>, vector<8x256xf32>
    %2 = arith.subf %0, %1 : vector<8x256xf32>
    %c0_3 = arith.constant 0 : index
    %c0_4 = arith.constant 0 : index
    %3 = vector.load %arg3[%c0_3, %c0_4] : memref<8x2304xf32, #tpu.memory_space<vmem>>, vector<8x256xf32>
    tpu.vector_store %arg3[%c0_3, %c0_4], %2 {strides = array<i32>} : memref<8x2304xf32, #tpu.memory_space<vmem>>, vector<8x256xf32>,
    %c0_5 = arith.constant 0 : index
    %c288 = arith.constant 288 : index
    %4 = vector.load %arg2[%c0_5, %c288] : memref<8x864xf32, #tpu.memory_space<vmem>>, vector<8x256xf32>
    %5 = arith.subf %0, %4 : vector<8x256xf32>
    %c0_6 = arith.constant 0 : index
    %c256 = arith.constant 256 : index
    %6 = vector.load %arg3[%c0_6, %c256] : memref<8x2304xf32, #tpu.memory_space<vmem>>, vector<8x256xf32>
    tpu.vector_store %arg3[%c0_6, %c256], %5 {strides = array<i32>} : memref<8x2304xf32, #tpu.memory_space<vmem>>, vector<8x256xf32>,
    %c0_7 = arith.constant 0 : index
    %c576 = arith.constant 576 : index
    %7 = vector.load %arg2[%c0_7, %c576] : memref<8x864xf32, #tpu.memory_space<vmem>>, vector<8x256xf32>
    %8 = arith.subf %0, %7 : vector<8x256xf32>
    %c0_8 = arith.constant 0 : index
    %c512 = arith.constant 512 : index
    %9 = vector.load %arg3[%c0_8, %c512] : memref<8x2304xf32, #tpu.memory_space<vmem>>, vector<8x256xf32>
    tpu.vector_store %arg3[%c0_8, %c512], %8 {strides = array<i32>} : memref<8x2304xf32, #tpu.memory_space<vmem>>, vector<8x256xf32>,
    %c0_9 = arith.constant 0 : index
    %c16 = arith.constant 16 : index
    %10 = vector.load %arg2[%c0_9, %c16] : memref<8x864xf32, #tpu.memory_space<vmem>>, vector<8x256xf32>
    %11 = arith.subf %0, %10 : vector<8x256xf32>
    %c0_10 = arith.constant 0 : index
    %c768 = arith.constant 768 : index
    %12 = vector.load %arg3[%c0_10, %c768] : memref<8x2304xf32, #tpu.memory_space<vmem>>, vector<8x256xf32>
    tpu.vector_store %arg3[%c0_10, %c768], %11 {strides = array<i32>} : memref<8x2304xf32, #tpu.memory_space<vmem>>, vector<8x256xf32>,
    %c0_11 = arith.constant 0 : index
    %c304 = arith.constant 304 : index
    %13 = vector.load %arg2[%c0_11, %c304] : memref<8x864xf32, #tpu.memory_space<vmem>>, vector<8x256xf32>
    %14 = arith.subf %0, %13 : vector<8x256xf32>
    %c0_12 = arith.constant 0 : index
    %c1024 = arith.constant 1024 : index
    %15 = vector.load %arg3[%c0_12, %c1024] : memref<8x2304xf32, #tpu.memory_space<vmem>>, vector<8x256xf32>
    tpu.vector_store %arg3[%c0_12, %c1024], %14 {strides = array<i32>} : memref<8x2304xf32, #tpu.memory_space<vmem>>, vector<8x256xf32>,
    %c0_13 = arith.constant 0 : index
    %c592 = arith.constant 592 : index
    %16 = vector.load %arg2[%c0_13, %c592] : memref<8x864xf32, #tpu.memory_space<vmem>>, vector<8x256xf32>
    %17 = arith.subf %0, %16 : vector<8x256xf32>
    %c0_14 = arith.constant 0 : index
    %c1280 = arith.constant 1280 : index
    %18 = vector.load %arg3[%c0_14, %c1280] : memref<8x2304xf32, #tpu.memory_space<vmem>>, vector<8x256xf32>
    tpu.vector_store %arg3[%c0_14, %c1280], %17 {strides = array<i32>} : memref<8x2304xf32, #tpu.memory_space<vmem>>, vector<8x256xf32>,
    %c0_15 = arith.constant 0 : index
    %c32 = arith.constant 32 : index
    %19 = vector.load %arg2[%c0_15, %c32] : memref<8x864xf32, #tpu.memory_space<vmem>>, vector<8x256xf32>
    %20 = arith.subf %0, %19 : vector<8x256xf32>
    %c0_16 = arith.constant 0 : index
    %c1536 = arith.constant 1536 : index
    %21 = vector.load %arg3[%c0_16, %c1536] : memref<8x2304xf32, #tpu.memory_space<vmem>>, vector<8x256xf32>
    tpu.vector_store %arg3[%c0_16, %c1536], %20 {strides = array<i32>} : memref<8x2304xf32, #tpu.memory_space<vmem>>, vector<8x256xf32>,
    %c0_17 = arith.constant 0 : index
    %c320 = arith.constant 320 : index
    %22 = vector.load %arg2[%c0_17, %c320] : memref<8x864xf32, #tpu.memory_space<vmem>>, vector<8x256xf32>
    %23 = arith.subf %0, %22 : vector<8x256xf32>
    %c0_18 = arith.constant 0 : index
    %c1792 = arith.constant 1792 : index
    %24 = vector.load %arg3[%c0_18, %c1792] : memref<8x2304xf32, #tpu.memory_space<vmem>>, vector<8x256xf32>
    tpu.vector_store %arg3[%c0_18, %c1792], %23 {strides = array<i32>} : memref<8x2304xf32, #tpu.memory_space<vmem>>, vector<8x256xf32>,
    %c0_19 = arith.constant 0 : index
    %c608 = arith.constant 608 : index
    %25 = vector.load %arg2[%c0_19, %c608] : memref<8x864xf32, #tpu.memory_space<vmem>>, vector<8x256xf32>
    %26 = arith.subf %0, %25 : vector<8x256xf32>
    %c0_20 = arith.constant 0 : index
    %c2048 = arith.constant 2048 : index
    %27 = vector.load %arg3[%c0_20, %c2048] : memref<8x2304xf32, #tpu.memory_space<vmem>>, vector<8x256xf32>
    tpu.vector_store %arg3[%c0_20, %c2048], %26 {strides = array<i32>} : memref<8x2304xf32, #tpu.memory_space<vmem>>, vector<8x256xf32>,
    return
  }
  func.func @transform_0(%arg0: i32) -> (i32, i32) {
    %c0_i32 = arith.constant 0 : i32
    %c0_i32_0 = arith.constant 0 : i32
    return %arg0, %c0_i32 : i32, i32
  }
  func.func @transform_1(%arg0: i32) -> (i32, i32) {
    %c0_i32 = arith.constant 0 : i32
    %c0_i32_0 = arith.constant 0 : i32
    return %arg0, %c0_i32 : i32, i32
  }
  func.func @transform_2(%arg0: i32) -> (i32, i32) {
    %c0_i32 = arith.constant 0 : i32
    %c0_i32_0 = arith.constant 0 : i32
    return %arg0, %c0_i32 : i32, i32
  }
}

</mosaic_0001>

<bundles_post_ra>
// kernel: subtraction2_forward.1
= control target key start
LH: loop header
LB: loop body
LE: loop exit
PB: predicated region body
PF: predicated region fallthrough
CT: control target
= control target key end

     0   :  { %s195_s13 = smov 96   ;;  %s196_s24 = smov 64   ;;  %vm31_vm0 = vcmask 785408   ;;  %vm52_vm1 = vcmask 523264   ;;  %vm73_vm2 = vcmask 916480   ;;  %vm94_vm3 = vcmask 654336   ;;  %s333_s1 = inlined_call_operand.vmem [shape: f32[8,864], index: 1, kind: input, shape index: {}]   ;;  %s334_s0 = inlined_call_operand.vmem [shape: f32[8,256], index: 0, kind: input, shape index: {}]   ;;  %s335_s2 = inlined_call_operand.vmem [shape: f32[8,2304], index: 2, kind: output, shape index: {}]  }
   0x1   :  { %v21_v0 = vld [vmem:[%s333_s1 + $0x20] sm:$0xff]  ;;  %v19_v1 = vld [vmem:[%s333_s1 + $0x10] sm:$0xff]  ;;  %v20_v2 = vld [vmem:[%s333_s1 + $0x18] sm:$0xff]  ;;  %s197_s4 = smov 112   ;;  %s198_s5 = smov 80   ;;  %vm115_vm4 = vcmask 392192  }
   0x2   :  { %29 = vrot.lane.b32.xlu1 %v21_v0, %s195_s13  ;;  %25 = vrot.lane.b32.xlu0 %v19_v1, %s195_s13  ;;  %v61_v3 = vld [vmem:[%s333_s1] sm:$0xff]  ;;  %v62_v5 = vld [vmem:[%s333_s1 + $0x8] sm:$0xff]  ;;  %s199_s6 = smov 48   ;;  %vm176_vm5 = vcmask 261120  }
   0x3   :  { %v233_v4 = vld [vmem:[%s334_s0] sm:$0xff]  ;;  %v241_v6 = vld [vmem:[%s334_s0 + $0x8] sm:$0xff]  ;;  %v42_v9 = vld [vmem:[%s333_s1 + $0x30] sm:$0xff] }
   0x4   :  { %v15_v7 = vsub.f32 %v233_v4, %v61_v3  ;;  %v16_v8 = vsub.f32 %v241_v6, %v62_v5  ;;  %v41_v10 = vld [vmem:[%s333_s1 + $0x28] sm:$0xff]  ;;  %s200_s1 = smov 32  }
   0x6   :  { %46 = vrot.lane.b32.xlu1 %v21_v0, %s196_s24  ;;  %27 = vrot.lane.b32.xlu0 %v20_v2, %s195_s13  ;;  %17 = vst [vmem:[%s335_s2] sm:$0xff] %v15_v7  ;;  %18 = vst [vmem:[%s335_s2 + $0x8] sm:$0xff] %v16_v8 }
   0xa   :  { %50 = vrot.lane.b32.xlu1 %v42_v9, %s196_s24  ;;  %48 = vrot.lane.b32.xlu0 %v41_v10, %s196_s24 }
   0xe   :  { %69 = vrot.lane.b32.xlu1 %v62_v5, %s197_s4  ;;  %67 = vrot.lane.b32.xlu0 %v61_v3, %s197_s4 }
  0x12   :  { %88 = vrot.lane.b32.xlu1 %v19_v1, %s198_s5  ;;  %71 = vrot.lane.b32.xlu0 %v19_v1, %s197_s4 }
  0x16   :  { %92 = vrot.lane.b32.xlu1 %v21_v0, %s198_s5  ;;  %90 = vrot.lane.b32.xlu0 %v20_v2, %s198_s5 }
  0x1a   :  { %111 = vrot.lane.b32.xlu1 %v41_v10, %s199_s6  ;;  %109 = vrot.lane.b32.xlu0 %v21_v0, %s199_s6 }
  0x1e   :  { %130 = vrot.lane.b32.xlu1 %v61_v3, %s195_s13  ;;  %113 = vrot.lane.b32.xlu0 %v42_v9, %s199_s6 }
  0x22   :  { %134 = vrot.lane.b32.xlu1 %v19_v1, %s195_s13  ;;  %132 = vrot.lane.b32.xlu0 %v62_v5, %s195_s13 }
  0x26   :  { %152 = vrot.lane.b32.xlu1 %v20_v2, %s196_s24  ;;  %150 = vrot.lane.b32.xlu0 %v19_v1, %s196_s24 }
  0x2a   :  { %170 = vrot.lane.b32.xlu1 %v21_v0, %s200_s1  ;;  %154 = vrot.lane.b32.xlu0 %v21_v0, %s196_s24 }
  0x2e   :  { %174 = vrot.lane.b32.xlu1 %v42_v9, %s200_s1  ;;  %172 = vrot.lane.b32.xlu0 %v41_v10, %s200_s1 }
  0x74   :  { %v30_v11 = vpop.permute.xlu1 %29  ;;  %v26_v12 = vpop.permute.xlu0 %25 }
  0x78   :  { %v47_v13 = vpop.permute.xlu1 %46  ;;  %v28_v14 = vpop.permute.xlu0 %27 }
  0x79   :  { %v32_v15 = vsel %vm31_vm0, %v26_v12, %v28_v14  ;;  %v33_v16 = vsel %vm31_vm0, %v28_v14, %v30_v11 }
  0x7a   :  { %v36_v17 = vsub.f32 %v233_v4, %v32_v15  ;;  %v37_v18 = vsub.f32 %v241_v6, %v33_v16 }
  0x7c   :  { %38 = vst [vmem:[%s335_s2 + $0x10] sm:$0xff] %v36_v17  ;;  %39 = vst [vmem:[%s335_s2 + $0x18] sm:$0xff] %v37_v18  ;;  %v51_v19 = vpop.permute.xlu1 %50  ;;  %v49_v20 = vpop.permute.xlu0 %48 }
  0x7d   :  { %v53_v21 = vsel %vm52_vm1, %v47_v13, %v49_v20  ;;  %v54_v22 = vsel %vm52_vm1, %v49_v20, %v51_v19 }
  0x7e   :  { %v57_v23 = vsub.f32 %v233_v4, %v53_v21  ;;  %v58_v24 = vsub.f32 %v241_v6, %v54_v22 }
  0x80   :  { %59 = vst [vmem:[%s335_s2 + $0x20] sm:$0xff] %v57_v23  ;;  %60 = vst [vmem:[%s335_s2 + $0x28] sm:$0xff] %v58_v24  ;;  %v70_v25 = vpop.permute.xlu1 %69  ;;  %v68_v26 = vpop.permute.xlu0 %67 }
  0x81   :  { %v74_v27 = vsel %vm73_vm2, %v68_v26, %v70_v25 }
  0x82   :  { %v78_v28 = vsub.f32 %v233_v4, %v74_v27 }
  0x84   :  { %80 = vst [vmem:[%s335_s2 + $0x30] sm:$0xff] %v78_v28  ;;  %v89_v29 = vpop.permute.xlu1 %88  ;;  %v72_v30 = vpop.permute.xlu0 %71 }
  0x85   :  { %v75_v31 = vsel %vm73_vm2, %v70_v25, %v72_v30 }
  0x86   :  { %v79_v32 = vsub.f32 %v241_v6, %v75_v31 }
  0x88   :  { %81 = vst [vmem:[%s335_s2 + $0x38] sm:$0xff] %v79_v32  ;;  %v93_v33 = vpop.permute.xlu1 %92  ;;  %v91_v34 = vpop.permute.xlu0 %90 }
  0x89   :  { %v95_v35 = vsel %vm94_vm3, %v89_v29, %v91_v34  ;;  %v96_v36 = vsel %vm94_vm3, %v91_v34, %v93_v33 }
  0x8a   :  { %v99_v37 = vsub.f32 %v233_v4, %v95_v35  ;;  %v100_v38 = vsub.f32 %v241_v6, %v96_v36 }
  0x8c   :  { %101 = vst [vmem:[%s335_s2 + $0x40] sm:$0xff] %v99_v37  ;;  %102 = vst [vmem:[%s335_s2 + $0x48] sm:$0xff] %v100_v38  ;;  %v112_v39 = vpop.permute.xlu1 %111  ;;  %v110_v40 = vpop.permute.xlu0 %109 }
  0x8d   :  { %v116_v41 = vsel %vm115_vm4, %v110_v40, %v112_v39 }
  0x8e   :  { %v120_v42 = vsub.f32 %v233_v4, %v116_v41 }
  0x90   :  { %122 = vst [vmem:[%s335_s2 + $0x50] sm:$0xff] %v120_v42  ;;  %v131_v43 = vpop.permute.xlu1 %130  ;;  %v114_v44 = vpop.permute.xlu0 %113 }
  0x91   :  { %v117_v45 = vsel %vm115_vm4, %v112_v39, %v114_v44 }
  0x92   :  { %v121_v46 = vsub.f32 %v241_v6, %v117_v45 }
  0x94   :  { %123 = vst [vmem:[%s335_s2 + $0x58] sm:$0xff] %v121_v46  ;;  %v135_v47 = vpop.permute.xlu1 %134  ;;  %v133_v48 = vpop.permute.xlu0 %132 }
  0x95   :  { %v136_v49 = vsel %vm31_vm0, %v131_v43, %v133_v48  ;;  %v137_v50 = vsel %vm31_vm0, %v133_v48, %v135_v47 }
  0x96   :  { %v140_v51 = vsub.f32 %v233_v4, %v136_v49  ;;  %v141_v52 = vsub.f32 %v241_v6, %v137_v50 }
  0x98   :  { %142 = vst [vmem:[%s335_s2 + $0x60] sm:$0xff] %v140_v51  ;;  %143 = vst [vmem:[%s335_s2 + $0x68] sm:$0xff] %v141_v52  ;;  %v153_v53 = vpop.permute.xlu1 %152  ;;  %v151_v54 = vpop.permute.xlu0 %150 }
  0x99   :  { %v156_v55 = vsel %vm52_vm1, %v151_v54, %v153_v53 }
  0x9a   :  { %v160_v56 = vsub.f32 %v233_v4, %v156_v55 }
  0x9c   :  { %162 = vst [vmem:[%s335_s2 + $0x70] sm:$0xff] %v160_v56  ;;  %v171_v57 = vpop.permute.xlu1 %170  ;;  %v155_v58 = vpop.permute.xlu0 %154 }
  0x9d   :  { %v157_v59 = vsel %vm52_vm1, %v153_v53, %v155_v58 }
  0x9e   :  { %v161_v60 = vsub.f32 %v241_v6, %v157_v59 }
  0xa0   :  { %163 = vst [vmem:[%s335_s2 + $0x78] sm:$0xff] %v161_v60  ;;  %v175_v61 = vpop.permute.xlu1 %174  ;;  %v173_v62 = vpop.permute.xlu0 %172 }
  0xa1   :  { %v177_v63 = vsel %vm176_vm5, %v171_v57, %v173_v62  ;;  %v178_v0 = vsel %vm176_vm5, %v173_v62, %v175_v61 }
  0xa2   :  { %v181_v1 = vsub.f32 %v233_v4, %v177_v63  ;;  %v182_v2 = vsub.f32 %v241_v6, %v178_v0 }
  0xa4   :  { %183 = vst [vmem:[%s335_s2 + $0x80] sm:$0xff] %v181_v1  ;;  %184 = vst [vmem:[%s335_s2 + $0x88] sm:$0xff] %v182_v2 }

</bundles_post_ra>
